<compile_context>
chip_gen: v6e
topology: v6e:2x2x1
jax: 0.10.0
libtpu: 0.0.40
codegen_flags: <defaults>
</compile_context>

<pallas_src>
import re

import jax
import jax.numpy as jnp
from jax.experimental import pallas as pl
from jax.experimental.pallas import tpu as pltpu


# ---------------------------------------------------------------------------
# Generation-aware tile-size defaults (picked once at import time).
# ---------------------------------------------------------------------------
def _tpu_generation() -> int:
    try:
        kind = jax.devices()[0].device_kind  # e.g. "TPU v5 lite", "TPU v6e", "TPU7x"
    except Exception:
        return 0
    m = re.search(r"(\d+)", kind)
    return int(m.group(1)) if m else 0


_GEN = _tpu_generation()
if _GEN >= 6:
    # v6e (128 MiB physical VMEM) / v7x (64 MiB): 8 MiB blocks.  Working set
    # is 2 operands x 2 buffers x 8 MiB = 32 MiB -> raise the scoped limit.
    _MAX_BLOCK_BYTES = 8 << 20
    _VMEM_LIMIT_BYTES = 48 << 20
else:
    # v5e (16 MiB default scoped VMEM) and unknown chips: 2 MiB blocks
    # (working set 8 MiB); at ~0.8 TB/s per-step overhead is already <7%.
    _MAX_BLOCK_BYTES = 2 << 20
    _VMEM_LIMIT_BYTES = None


# ---------------------------------------------------------------------------
# Kernel + pallas_call wrapper
# ---------------------------------------------------------------------------
def _relu_kernel(x_ref, o_ref):
    o_ref[...] = jnp.maximum(x_ref[...], jnp.zeros((), x_ref.dtype))


def _relu_slab(x2d: jax.Array, block_rows: int) -> jax.Array:
    rows, lanes = x2d.shape
    spec = pl.BlockSpec((block_rows, lanes), lambda i: (i, 0))
    cp = dict(dimension_semantics=("parallel",))
    if _VMEM_LIMIT_BYTES is not None:
        cp["vmem_limit_bytes"] = _VMEM_LIMIT_BYTES
    return pl.pallas_call(
        _relu_kernel,
        out_shape=jax.ShapeDtypeStruct((rows, lanes), x2d.dtype),
        grid_spec=pltpu.PrefetchScalarGridSpec(
            num_scalar_prefetch=0,
            grid=(pl.cdiv(rows, block_rows),),
            in_specs=[spec],
            out_specs=spec,
        ),
        # Slab is dead after the call: donate it and compute in place.
        input_output_aliases={0: 0},
        # Bandwidth-dominated cost hint so surrounding fusions schedule sanely.
        cost_estimate=pl.CostEstimate(
            flops=rows * lanes,
            bytes_accessed=2 * rows * lanes * x2d.dtype.itemsize,
            transcendentals=0,
        ),
        compiler_params=pltpu.CompilerParams(**cp),
        # TODO(synk): on v7x, confirm in xprof that the 1-D "parallel" axis
        # shards across both TensorCores; if Mosaic serializes it, add an
        # explicit leading grid axis of size 2 that halves the rows.
    )(x2d)


# ---------------------------------------------------------------------------
# Static (trace-time) layout / tiling selection
# ---------------------------------------------------------------------------
def _choose_layout(n: int, itemsize: int):
    """Return (lanes, rows, pad, block_rows) for a flat slab of n elements."""
    # Widest lane-dense last dim that divides n exactly, preferring >= 32 rows
    # so a >= 4-step grid of 8-row-multiple blocks is always possible.
    lanes = None
    for cand in (2048, 1024, 512, 256, 128):
        if n % cand == 0 and n // cand >= 32:
            lanes = cand
            break
    if lanes is None:
        for cand in (2048, 1024, 512, 256, 128):
            if n % cand == 0:
                lanes = cand
                break
    if lanes is None:
        lanes = 128  # odd size: pad (relu(0)==0; tail is sliced off afterwards)
    pad = (-n) % lanes
    rows = (n + pad) // lanes

    max_block_rows = max(8, (_MAX_BLOCK_BYTES // (lanes * itemsize)) // 8 * 8)
    if rows > max_block_rows:
        block_rows = max_block_rows
    else:
        # Fits in one block: still split ~4 ways (multiple-of-8 rows) so the
        # in/out DMAs overlap and v7x's second TensorCore gets work.
        block_rows = max(8, (rows // 4) // 8 * 8)
        if block_rows >= rows:
            block_rows = rows  # tiny slab: single full-extent block is legal
    return lanes, rows, pad, block_rows


# ---------------------------------------------------------------------------
# Public entry points
# ---------------------------------------------------------------------------
@jax.jit
def crelu_planes(planes: jax.Array) -> jax.Array:
    """ReLU over an already-planar real-valued array (any shape / real dtype).

    Zero-glue hot path: if the surrounding model keeps activations as planar
    (real, imag) float32, call this directly and skip the complex conversion.
    """
    n = planes.size
    lanes, rows, pad, block_rows = _choose_layout(n, planes.dtype.itemsize)
    flat = planes.reshape(-1)
    if pad:
        flat = jnp.pad(flat, (0, pad))
    out2d = _relu_slab(flat.reshape(rows, lanes), block_rows)
    out_flat = out2d.reshape(-1)
    if pad:
        out_flat = out_flat[:n]
    return out_flat.reshape(planes.shape)


@jax.jit
def crelu(z: jax.Array) -> jax.Array:
    """Complex ReLU matching the PyTorch module: relu(Re(z)) + 1j*relu(Im(z))."""
    # Single fused deinterleave into one contiguous planar slab (real/imag of
    # complex64 are already float32 -- no cast).
    planes = jnp.stack([jnp.real(z), jnp.imag(z)])  # (2, *z.shape)
    out_planes = crelu_planes(planes)
    # Single fused reinterleave back to complex.
    return jax.lax.complex(out_planes[0], out_planes[1])


# ---------------------------------------------------------------------------
# Demo / self-test
# ---------------------------------------------------------------------------
if __name__ == "__main__":
    key = jax.random.PRNGKey(0)
    k_re, k_im = jax.random.split(key)

    # NCHW-style complex activation, matching a typical conv input.
    shape = (2, 4, 16, 16)
    z = jax.lax.complex(
        jax.random.normal(k_re, shape, dtype=jnp.float32),
        jax.random.normal(k_im, shape, dtype=jnp.float32),
    )

    out = jax.block_until_ready(crelu(z))
    ref = jax.lax.complex(jnp.maximum(jnp.real(z), 0.0),
                          jnp.maximum(jnp.imag(z), 0.0))
    assert out.shape == z.shape
    assert out.dtype == jnp.complex64
    assert jnp.allclose(out, ref, atol=1e-6)

    # Odd (non-128-divisible) size exercises the pad / slice fallback path.
    shape2 = (3, 5, 7)
    k2a, k2b = jax.random.split(k_im)
    z2 = jax.lax.complex(
        jax.random.normal(k2a, shape2, dtype=jnp.float32),
        jax.random.normal(k2b, shape2, dtype=jnp.float32),
    )
    out2 = jax.block_until_ready(crelu(z2))
    ref2 = jax.lax.complex(jnp.maximum(jnp.real(z2), 0.0),
                           jnp.maximum(jnp.imag(z2), 0.0))
    assert out2.shape == z2.shape
    assert jnp.allclose(out2, ref2, atol=1e-6)

    print("KERNEL_OK")
</pallas_src>

<mosaic_0001>
module attributes {stable_mosaic.version = 11 : i64} {
  func.func @_relu_kernel(%arg0: i32, %arg1: memref<8x128xf32, #tpu.memory_space<vmem>>, %arg2: memref<8x128xf32, #tpu.memory_space<vmem>>) attributes {dimension_semantics = [#tpu.dimension_semantics<parallel>], iteration_bounds = array<i64: 4>, scalar_prefetch = 0 : i64, scratch_operands = 0 : i64, tpu.core_type = #tpu.core_type<tc>, window_params = [{transform_indices = @transform_0, window_bounds = array<i64: 8, 128>}, {transform_indices = @transform_1, window_bounds = array<i64: 8, 128>}]} {
    %c0 = arith.constant 0 : index
    %c0_0 = arith.constant 0 : index
    %0 = vector.load %arg1[%c0, %c0_0] : memref<8x128xf32, #tpu.memory_space<vmem>>, vector<8x128xf32>
    %cst = arith.constant 0.000000e+00 : f32
    %1 = vector.broadcast %cst : f32 to vector<8x128xf32>
    %2 = arith.maximumf %0, %1 : vector<8x128xf32>
    %c0_1 = arith.constant 0 : index
    %c0_2 = arith.constant 0 : index
    %3 = vector.load %arg2[%c0_1, %c0_2] : memref<8x128xf32, #tpu.memory_space<vmem>>, vector<8x128xf32>
    tpu.vector_store %arg2[%c0_1, %c0_2], %2 {strides = array<i32>} : memref<8x128xf32, #tpu.memory_space<vmem>>, vector<8x128xf32>,
    return
  }
  func.func @transform_0(%arg0: i32) -> (i32, i32) {
    %c0_i32 = arith.constant 0 : i32
    %c0_i32_0 = arith.constant 0 : i32
    return %arg0, %c0_i32 : i32, i32
  }
  func.func @transform_1(%arg0: i32) -> (i32, i32) {
    %c0_i32 = arith.constant 0 : i32
    %c0_i32_0 = arith.constant 0 : i32
    return %arg0, %c0_i32 : i32, i32
  }
}

</mosaic_0001>

<bundles_post_ra>
// kernel: crelu_planes.1
= control target key start
LH: loop header
LB: loop body
LE: loop exit
PB: predicated region body
PF: predicated region fallthrough
CT: control target
= control target key end

     0   :  { %s189_s6 = smov 0   ;;  %s209_s0 = inlined_call_operand.vmem [shape: f32[32,128], index: 0, kind: input, shape index: {}, may-alias: {0,1}]   ;;  %s210_s1 = inlined_call_operand.vmem [shape: f32[32,128], index: 1, kind: output, shape index: {}, may-alias: {0,1}]  }
   0x1 LB: > { %s168_s7 = sadd.s32 4294967295, %s191_s6   ;;  %p172_p0 = scmp.ge.s32.totalorder %s191_s6, 1  ;;  %s191_s6 = sphi %s189_s6, %s11_s6  }
   0x2   : > { %p86_p1 = scmp.lt.s32.totalorder %s191_s6, 5 }
   0x4   : > { %p87_p2 = pnand %p172_p0, %p86_p1 }
   0x5   : > { %p104_p3 = scmp.lt.s32.totalorder (!%p87_p2), %s168_s7, 3 }
   0x6   : > { %90 = sbr.rel (%p87_p2) target bundleno = 18 (0x12), region = 24 }
   0xb   : > { %s212_s7 = smov (!%p104_p3, %s168_s7), 3 }
   0xc   : > { %s173_s8 = sshll.u32 %s212_s7, 3 }
   0xd   : > { %s107_s11 = scalar_lea.vmem %s209_s0, %s173_s8  ;;  %s111_s14 = scalar_lea.vmem %s210_s1, %s173_s8 }
   0xe   : > { %v112_v0 = vld [vmem:[%s107_s11] sm:$0xff] }
   0xf   : > { %v113_v1 = vmax.f32 %v112_v0, 0.0 }
  0x11   : > { %114 = vst [vmem:[%s111_s14] sm:$0xff] %v113_v1 }
  0x12 PF: > { %s11_s6 = sadd.s32 1, %s191_s6  }
  0x13   : > { %p8_p4 = scmp.ge.s32.totalorder %s11_s6, 6  }
  0x15   :  { %10 = sbr.rel (!%p8_p4) target bundleno = 1 (0x1), region = 54 }

</bundles_post_ra>
